<compile_context>
chip_gen: v7x
topology: tpu7x:2x2x1
jax: 0.10.0
libtpu: 0.0.40
codegen_flags: <defaults>
</compile_context>

<pallas_src>
import jax
import jax.numpy as jnp
from jax.experimental import pallas as pl
from jax.experimental.pallas import tpu as pltpu

LANE = 128          # pad every filter / fc / output width to this
NEG_BIG = -1.0e30   # additive mask value for invalid conv positions


def _round_up(x, m):
    return (x + m - 1) // m * m


# ----------------------------------------------------------------------------
# Fused kernel: im2col conv -> mask -> maxpool -> bias+ReLU -> FC stack -> out
# ----------------------------------------------------------------------------
def _fused_forward_kernel(emb_ref, wconv_ref, bconv_ref, mask_ref, *rest):
    """ParallelCNN forward (post-embedding) for one batch tile.

    emb_ref  : [bt, S, E]       embedding activations (matmul dtype)
    wconv_ref: [kmax*E, FP]     im2col conv weight (zero padded to FP lanes)
    bconv_ref: [1, FP]   f32    concatenated conv biases (zero padded)
    mask_ref : [S, FP]   f32    0 = valid conv position, NEG_BIG = invalid
    rest     : num_fc * (W[FP,FP], b[1,FP]), W_out[FP,FP], b_out[1,FP], o_ref
    o_ref    : [bt, FP]  f32
    """
    num_fc = (len(rest) - 3) // 2
    fc_refs = rest[: 2 * num_fc]
    wout_ref, bout_ref, o_ref = rest[2 * num_fc:]

    bt, S, E = emb_ref.shape
    KE, FP = wconv_ref.shape
    kmax = KE // E

    emb = emb_ref[...]                                           # [bt, S, E]
    if kmax > 1:
        emb_ext = jnp.concatenate(
            [emb, jnp.zeros((bt, kmax - 1, E), emb.dtype)], axis=1)
    else:
        emb_ext = emb

    # im2col: shifted windows stacked along the lane axis -> ONE K=kmax*E matmul.
    lhs = jnp.concatenate([emb_ext[:, i:i + S, :] for i in range(kmax)],
                          axis=-1)                               # [bt, S, kmax*E]
    conv = jax.lax.dot_general(
        lhs, wconv_ref[...],
        dimension_numbers=(((2,), (0,)), ((), ())),
        preferred_element_type=jnp.float32)                      # [bt, S, FP] f32

    # mask invalid positions, max-pool over positions, then bias + ReLU
    conv = conv + mask_ref[...]                                  # bcast [S, FP]
    pooled = jnp.max(conv, axis=1)                               # [bt, FP]
    x = jnp.maximum(pooled + bconv_ref[...], 0.0)                # [bt, FP]

    # FC stack (dropout == identity in eval mode)
    for l in range(num_fc):
        w = fc_refs[2 * l][...]
        b = fc_refs[2 * l + 1][...]
        x = jnp.dot(x.astype(w.dtype), w, preferred_element_type=jnp.float32)
        x = jnp.maximum(x + b, 0.0)

    wo = wout_ref[...]
    out = jnp.dot(x.astype(wo.dtype), wo, preferred_element_type=jnp.float32)
    o_ref[...] = out + bout_ref[...]


# ----------------------------------------------------------------------------
# Parameter construction (PyTorch layout) + padded/fused kernel layout
# ----------------------------------------------------------------------------
def init_params(key, cfg):
    p = cfg["params"]
    V, E = p["vocab_size"], p["embedding_size"]
    Fn, ks = p["num_filters"], p["filter_sizes"]
    FC, nfc, O = p["fc_size"], p["num_fc_layers"], p["output_size"]

    keys = iter(jax.random.split(key, 1 + 2 * len(ks) + 2 * nfc + 2))

    params = {"emb": jax.random.normal(next(keys), (V, E), jnp.float32)}

    convs = []
    for k in ks:
        bound = 1.0 / float(k * E) ** 0.5
        w = jax.random.uniform(next(keys), (Fn, k, E), jnp.float32, -bound, bound)
        b = jax.random.uniform(next(keys), (Fn,), jnp.float32, -bound, bound)
        convs.append({"w": w, "b": b, "k": k})
    params["convs"] = convs

    # NOTE: the PyTorch module declares every FC layer with input
    # num_filters*len(filter_sizes); that only executes when num_fc_layers==1
    # or fc_size == num_filters*len(filter_sizes).  We chain sizes so the
    # stack is runnable (first: concat -> fc_size, then fc_size -> fc_size).
    fcs = []
    in_dim = Fn * len(ks)
    for _ in range(nfc):
        bound = 1.0 / float(in_dim) ** 0.5
        w = jax.random.uniform(next(keys), (in_dim, FC), jnp.float32, -bound, bound)
        b = jax.random.uniform(next(keys), (FC,), jnp.float32, -bound, bound)
        fcs.append({"w": w, "b": b})
        in_dim = FC
    params["fcs"] = fcs

    bound = 1.0 / float(FC) ** 0.5
    params["out_w"] = jax.random.uniform(next(keys), (FC, O), jnp.float32, -bound, bound)
    params["out_b"] = jax.random.uniform(next(keys), (O,), jnp.float32, -bound, bound)
    return params


def prepare_fused_params(params, seq_len, matmul_dtype=jnp.float32):
    """Build lane-dense (128-padded), im2col-concatenated weights for the kernel.

    matmul_dtype: set to jnp.bfloat16 on v6e/v7x for ~2-3x MXU throughput and
    half the weight DMA; keep f32 (default) for bit-tight reference checks and
    on v5e (no bf16 VPU/EUP).  Biases / mask stay f32 either way.
    """
    convs = params["convs"]
    ks = [c["k"] for c in convs]
    kmax = max(ks)
    assert seq_len >= kmax, "sequence shorter than the largest filter size"

    Fn = convs[0]["w"].shape[0]
    E = convs[0]["w"].shape[2]
    F_total = Fn * len(convs)
    dims = [F_total] + [l["w"].shape[1] for l in params["fcs"]] + [params["out_w"].shape[1]]
    FP = _round_up(max(dims), LANE)

    wconv = jnp.zeros((kmax * E, FP), jnp.float32)     # im2col layout: (shift, e)
    bconv = jnp.zeros((1, FP), jnp.float32)
    mask = jnp.zeros((seq_len, FP), jnp.float32)       # additive; 0 = valid
    for ci, c in enumerate(convs):
        k = c["k"]
        lo = ci * Fn
        w_kef = jnp.transpose(c["w"], (1, 2, 0)).reshape(k * E, Fn)  # [k*E, Fn]
        wconv = wconv.at[:k * E, lo:lo + Fn].set(w_kef)
        bconv = bconv.at[0, lo:lo + Fn].set(c["b"])
        L = seq_len - k + 1
        col = jnp.where(jnp.arange(seq_len) < L, 0.0, NEG_BIG).astype(jnp.float32)
        mask = mask.at[:, lo:lo + Fn].set(col[:, None])
    # Padding columns (>= F_total) stay all-valid & all-zero -> pooled value 0.

    fcs = []
    for layer in params["fcs"]:
        w, b = layer["w"], layer["b"]
        wp = jnp.zeros((FP, FP), jnp.float32).at[:w.shape[0], :w.shape[1]].set(w)
        bp = jnp.zeros((1, FP), jnp.float32).at[0, :b.shape[0]].set(b)
        fcs.append((wp.astype(matmul_dtype), bp))

    wo, bo = params["out_w"], params["out_b"]
    wout = jnp.zeros((FP, FP), jnp.float32).at[:wo.shape[0], :wo.shape[1]].set(wo)
    bout = jnp.zeros((1, FP), jnp.float32).at[0, :bo.shape[0]].set(bo)

    return {"table": params["emb"], "wconv": wconv.astype(matmul_dtype),
            "bconv": bconv, "mask": mask, "fcs": fcs,
            "wout": wout.astype(matmul_dtype), "bout": bout,
            "kmax": kmax, "fp": FP, "out_dim": int(bo.shape[0]),
            "seq_len": seq_len, "matmul_dtype": matmul_dtype}


# ----------------------------------------------------------------------------
# Wrapper: XLA embedding gather + single pallas_call, batch-tiled grid
# ----------------------------------------------------------------------------
def _pick_batch_tile(B, batch_tile):
    """bt multiple of 8 that divides B; prefer >=2 grid steps (v7x: 2 TCs)."""
    best = None
    bt = min(batch_tile, B)
    bt -= bt % 8
    while bt >= 8:
        if B % bt == 0:
            if B // bt >= 2:
                return bt
            if best is None:
                best = bt
        bt -= 8
    return best if best is not None else B     # fall back: whole batch, grid=(1,)


def parallel_cnn_forward(fused, tokens, *, batch_tile=128):
    B, S = tokens.shape
    assert S == fused["seq_len"]
    FP, kmax = fused["fp"], fused["kmax"]
    table = fused["table"]
    V, E = table.shape
    dtype = fused["matmul_dtype"]
    num_fc = len(fused["fcs"])

    # Real embedding row gather (XLA) — no O(B*S*V) one-hot, any vocab size.
    emb = jnp.take(table, tokens.astype(jnp.int32), axis=0).astype(dtype)  # [B,S,E]

    bt = _pick_batch_tile(B, batch_tile)
    grid = (B // bt,)

    res2 = lambda i: (0, 0)      # weight blocks: resident across batch tiles

    in_specs = [
        pl.BlockSpec((bt, S, E), lambda i: (i, 0, 0)),   # embeddings (batch tiled)
        pl.BlockSpec((kmax * E, FP), res2),              # im2col conv weight
        pl.BlockSpec((1, FP), res2),                     # conv bias
        pl.BlockSpec((S, FP), res2),                     # position mask
    ]
    args = [emb, fused["wconv"], fused["bconv"], fused["mask"]]
    for (w, b) in fused["fcs"]:
        in_specs += [pl.BlockSpec((FP, FP), res2), pl.BlockSpec((1, FP), res2)]
        args += [w, b]
    in_specs += [pl.BlockSpec((FP, FP), res2), pl.BlockSpec((1, FP), res2)]
    args += [fused["wout"], fused["bout"]]

    itemsize = jnp.dtype(dtype).itemsize
    flops = 2 * B * S * (kmax * E) * FP + (num_fc + 1) * 2 * B * FP * FP
    bytes_accessed = (B * S * E * itemsize
                      + (kmax * E + (num_fc + 1) * FP) * FP * itemsize
                      + (num_fc + 2) * FP * 4 + S * FP * 4
                      + B * FP * 4)
    cost = pl.CostEstimate(flops=flops, transcendentals=0,
                           bytes_accessed=bytes_accessed)

    out_padded = pl.pallas_call(
        _fused_forward_kernel,
        out_shape=jax.ShapeDtypeStruct((B, FP), jnp.float32),
        grid_spec=pltpu.PrefetchScalarGridSpec(
            num_scalar_prefetch=0,
            grid=grid,
            in_specs=in_specs,
            out_specs=pl.BlockSpec((bt, FP), lambda i: (i, 0)),
        ),
        compiler_params=pltpu.CompilerParams(
            dimension_semantics=("parallel",),
            vmem_limit_bytes=48 * 1024 * 1024),   # above v5e 16 MiB default, below v7x physical
        cost_estimate=cost,
    )(*args)
    return out_padded[:, : fused["out_dim"]]


# ----------------------------------------------------------------------------
# Pure-JAX reference (PyTorch semantics) for the correctness check
# ----------------------------------------------------------------------------
def reference_forward(params, tokens):
    emb = params["emb"][tokens]                       # [B, S, E]
    B, S, E = emb.shape
    pooled = []
    for c in params["convs"]:
        w, b, k = c["w"], c["b"], c["k"]              # w: [Fn, k, E]
        L = S - k + 1
        win = jnp.stack([emb[:, i:i + L, :] for i in range(k)], axis=2)  # [B,L,k,E]
        s = jnp.einsum("blke,fke->blf", win, w) + b   # [B, L, Fn]
        s = jnp.maximum(s, 0.0)
        pooled.append(jnp.max(s, axis=1))             # [B, Fn]
    x = jnp.concatenate(pooled, axis=1)
    for layer in params["fcs"]:
        x = jnp.maximum(x @ layer["w"] + layer["b"], 0.0)
    return x @ params["out_w"] + params["out_b"]


if __name__ == "__main__":
    config = {
        "params": {
            "vocab_size": 50,
            "embedding_size": 32,
            "num_filters": 16,
            "filter_sizes": [2, 3, 4],
            "fc_size": 32,
            "num_fc_layers": 2,
            "dropout": 0.5,
            "output_size": 8,
        }
    }

    key = jax.random.PRNGKey(0)
    pkey, xkey = jax.random.split(key)
    params = init_params(pkey, config)

    B, S = 2, 8
    tokens = jax.random.randint(xkey, (B, S), 0, config["params"]["vocab_size"],
                                dtype=jnp.int32)

    fused = prepare_fused_params(params, S)          # f32 for a tight ref check
    out = parallel_cnn_forward(fused, tokens)
    out = jax.block_until_ready(out)

    ref = reference_forward(params, tokens)
    assert out.shape == (B, config["params"]["output_size"])
    assert jnp.allclose(out, ref, atol=1e-4, rtol=1e-4), "mismatch vs JAX reference"

    print("KERNEL_OK")
</pallas_src>

<mosaic_0001>
module attributes {stable_mosaic.version = 11 : i64} {
  func.func @_fused_forward_kernel(%arg0: i32, %arg1: memref<2x8x32xf32, #tpu.memory_space<vmem>>, %arg2: memref<128x128xf32, #tpu.memory_space<vmem>>, %arg3: memref<1x128xf32, #tpu.memory_space<vmem>>, %arg4: memref<8x128xf32, #tpu.memory_space<vmem>>, %arg5: memref<128x128xf32, #tpu.memory_space<vmem>>, %arg6: memref<1x128xf32, #tpu.memory_space<vmem>>, %arg7: memref<128x128xf32, #tpu.memory_space<vmem>>, %arg8: memref<1x128xf32, #tpu.memory_space<vmem>>, %arg9: memref<128x128xf32, #tpu.memory_space<vmem>>, %arg10: memref<1x128xf32, #tpu.memory_space<vmem>>, %arg11: memref<2x128xf32, #tpu.memory_space<vmem>>) attributes {dimension_semantics = [#tpu.dimension_semantics<parallel>], iteration_bounds = array<i64: 1>, scalar_prefetch = 0 : i64, scratch_operands = 0 : i64, tpu.core_type = #tpu.core_type<tc>, window_params = [{transform_indices = @transform_0, window_bounds = array<i64: 2, 8, 32>}, {pipeline_mode = #tpu.pipeline_mode<synchronous>, transform_indices = @transform_1, window_bounds = array<i64: 128, 128>}, {pipeline_mode = #tpu.pipeline_mode<synchronous>, transform_indices = @transform_2, window_bounds = array<i64: 1, 128>}, {pipeline_mode = #tpu.pipeline_mode<synchronous>, transform_indices = @transform_3, window_bounds = array<i64: 8, 128>}, {pipeline_mode = #tpu.pipeline_mode<synchronous>, transform_indices = @transform_4, window_bounds = array<i64: 128, 128>}, {pipeline_mode = #tpu.pipeline_mode<synchronous>, transform_indices = @transform_5, window_bounds = array<i64: 1, 128>}, {pipeline_mode = #tpu.pipeline_mode<synchronous>, transform_indices = @transform_6, window_bounds = array<i64: 128, 128>}, {pipeline_mode = #tpu.pipeline_mode<synchronous>, transform_indices = @transform_7, window_bounds = array<i64: 1, 128>}, {pipeline_mode = #tpu.pipeline_mode<synchronous>, transform_indices = @transform_8, window_bounds = array<i64: 128, 128>}, {pipeline_mode = #tpu.pipeline_mode<synchronous>, transform_indices = @transform_9, window_bounds = array<i64: 1, 128>}, {transform_indices = @transform_10, window_bounds = array<i64: 2, 128>}]} {
    %c0 = arith.constant 0 : index
    %c0_0 = arith.constant 0 : index
    %c0_1 = arith.constant 0 : index
    %0 = vector.load %arg1[%c0, %c0_0, %c0_1] : memref<2x8x32xf32, #tpu.memory_space<vmem>>, vector<2x8x32xf32>
    %cst = arith.constant 0.000000e+00 : f32
    %1 = vector.broadcast %cst : f32 to vector<2x3x32xf32>
    %2 = tpu.concatenate %0, %1 in 1 : vector<2x8x32xf32>, vector<2x3x32xf32> -> vector<2x11x32xf32>
    %3 = vector.extract_strided_slice %2 {offsets = [0, 0, 0], sizes = [2, 8, 32], strides = [1, 1, 1]} : vector<2x11x32xf32> to vector<2x8x32xf32>
    %4 = vector.extract_strided_slice %2 {offsets = [0, 1, 0], sizes = [2, 8, 32], strides = [1, 1, 1]} : vector<2x11x32xf32> to vector<2x8x32xf32>
    %5 = vector.extract_strided_slice %2 {offsets = [0, 2, 0], sizes = [2, 8, 32], strides = [1, 1, 1]} : vector<2x11x32xf32> to vector<2x8x32xf32>
    %6 = vector.extract_strided_slice %2 {offsets = [0, 3, 0], sizes = [2, 8, 32], strides = [1, 1, 1]} : vector<2x11x32xf32> to vector<2x8x32xf32>
    %7 = tpu.concatenate %3, %4, %5, %6 in 2 : vector<2x8x32xf32>, vector<2x8x32xf32>, vector<2x8x32xf32>, vector<2x8x32xf32> -> vector<2x8x128xf32>
    %c0_2 = arith.constant 0 : index
    %c0_3 = arith.constant 0 : index
    %8 = vector.load %arg2[%c0_2, %c0_3] : memref<128x128xf32, #tpu.memory_space<vmem>>, vector<128x128xf32>
    %cst_4 = arith.constant dense<0.000000e+00> : vector<2x8x128xf32>
    %9 = tpu.matmul %7, %8, %cst_4 {dimension_numbers = #tpu.dot_dimension_numbers<[2], [0], [0, 1], [1], [0, 0, 0, 1, 1, 1], [], []>} : vector<2x8x128xf32>, vector<128x128xf32>, vector<2x8x128xf32> -> vector<2x8x128xf32>
    %c0_5 = arith.constant 0 : index
    %c0_6 = arith.constant 0 : index
    %10 = vector.load %arg4[%c0_5, %c0_6] : memref<8x128xf32, #tpu.memory_space<vmem>>, vector<8x128xf32>
    %11 = vector.shape_cast %10 : vector<8x128xf32> to vector<1x8x128xf32>
    %12 = vector.broadcast %11 : vector<1x8x128xf32> to vector<2x8x128xf32>
    %13 = arith.addf %9, %12 : vector<2x8x128xf32>
    %cst_7 = arith.constant dense<0xFF800000> : vector<2x128xf32>
    %14 = vector.multi_reduction <maximumf>, %13, %cst_7 [1] : vector<2x8x128xf32> to vector<2x128xf32>
    %c0_8 = arith.constant 0 : index
    %c0_9 = arith.constant 0 : index
    %15 = vector.load %arg3[%c0_8, %c0_9] : memref<1x128xf32, #tpu.memory_space<vmem>>, vector<1x128xf32>
    %16 = vector.broadcast %15 : vector<1x128xf32> to vector<2x128xf32>
    %17 = arith.addf %14, %16 : vector<2x128xf32>
    %cst_10 = arith.constant 0.000000e+00 : f32
    %18 = vector.broadcast %cst_10 : f32 to vector<2x128xf32>
    %19 = arith.maximumf %17, %18 : vector<2x128xf32>
    %c0_11 = arith.constant 0 : index
    %c0_12 = arith.constant 0 : index
    %20 = vector.load %arg5[%c0_11, %c0_12] : memref<128x128xf32, #tpu.memory_space<vmem>>, vector<128x128xf32>
    %c0_13 = arith.constant 0 : index
    %c0_14 = arith.constant 0 : index
    %21 = vector.load %arg6[%c0_13, %c0_14] : memref<1x128xf32, #tpu.memory_space<vmem>>, vector<1x128xf32>
    %cst_15 = arith.constant dense<0.000000e+00> : vector<2x128xf32>
    %22 = tpu.matmul %19, %20, %cst_15 {dimension_numbers = #tpu.dot_dimension_numbers<[1], [0], [0], [1], [0, 0, 1, 1], [], []>} : vector<2x128xf32>, vector<128x128xf32>, vector<2x128xf32> -> vector<2x128xf32>
    %23 = vector.broadcast %21 : vector<1x128xf32> to vector<2x128xf32>
    %24 = arith.addf %22, %23 : vector<2x128xf32>
    %cst_16 = arith.constant 0.000000e+00 : f32
    %25 = vector.broadcast %cst_16 : f32 to vector<2x128xf32>
    %26 = arith.maximumf %24, %25 : vector<2x128xf32>
    %c0_17 = arith.constant 0 : index
    %c0_18 = arith.constant 0 : index
    %27 = vector.load %arg7[%c0_17, %c0_18] : memref<128x128xf32, #tpu.memory_space<vmem>>, vector<128x128xf32>
    %c0_19 = arith.constant 0 : index
    %c0_20 = arith.constant 0 : index
    %28 = vector.load %arg8[%c0_19, %c0_20] : memref<1x128xf32, #tpu.memory_space<vmem>>, vector<1x128xf32>
    %cst_21 = arith.constant dense<0.000000e+00> : vector<2x128xf32>
    %29 = tpu.matmul %26, %27, %cst_21 {dimension_numbers = #tpu.dot_dimension_numbers<[1], [0], [0], [1], [0, 0, 1, 1], [], []>} : vector<2x128xf32>, vector<128x128xf32>, vector<2x128xf32> -> vector<2x128xf32>
    %30 = vector.broadcast %28 : vector<1x128xf32> to vector<2x128xf32>
    %31 = arith.addf %29, %30 : vector<2x128xf32>
    %cst_22 = arith.constant 0.000000e+00 : f32
    %32 = vector.broadcast %cst_22 : f32 to vector<2x128xf32>
    %33 = arith.maximumf %31, %32 : vector<2x128xf32>
    %c0_23 = arith.constant 0 : index
    %c0_24 = arith.constant 0 : index
    %34 = vector.load %arg9[%c0_23, %c0_24] : memref<128x128xf32, #tpu.memory_space<vmem>>, vector<128x128xf32>
    %cst_25 = arith.constant dense<0.000000e+00> : vector<2x128xf32>
    %35 = tpu.matmul %33, %34, %cst_25 {dimension_numbers = #tpu.dot_dimension_numbers<[1], [0], [0], [1], [0, 0, 1, 1], [], []>} : vector<2x128xf32>, vector<128x128xf32>, vector<2x128xf32> -> vector<2x128xf32>
    %c0_26 = arith.constant 0 : index
    %c0_27 = arith.constant 0 : index
    %36 = vector.load %arg10[%c0_26, %c0_27] : memref<1x128xf32, #tpu.memory_space<vmem>>, vector<1x128xf32>
    %37 = vector.broadcast %36 : vector<1x128xf32> to vector<2x128xf32>
    %38 = arith.addf %35, %37 : vector<2x128xf32>
    %c0_28 = arith.constant 0 : index
    %c0_29 = arith.constant 0 : index
    %39 = vector.load %arg11[%c0_28, %c0_29] : memref<2x128xf32, #tpu.memory_space<vmem>>, vector<2x128xf32>
    tpu.vector_store %arg11[%c0_28, %c0_29], %38 {strides = array<i32>} : memref<2x128xf32, #tpu.memory_space<vmem>>, vector<2x128xf32>,
    return
  }
  func.func @transform_0(%arg0: i32) -> (i32, i32, i32) {
    %c0_i32 = arith.constant 0 : i32
    %c0_i32_0 = arith.constant 0 : i32
    %c0_i32_1 = arith.constant 0 : i32
    return %arg0, %c0_i32, %c0_i32_0 : i32, i32, i32
  }
  func.func @transform_1(%arg0: i32) -> (i32, i32) {
    %c0_i32 = arith.constant 0 : i32
    %c0_i32_0 = arith.constant 0 : i32
    %c0_i32_1 = arith.constant 0 : i32
    return %c0_i32, %c0_i32_0 : i32, i32
  }
  func.func @transform_2(%arg0: i32) -> (i32, i32) {
    %c0_i32 = arith.constant 0 : i32
    %c0_i32_0 = arith.constant 0 : i32
    %c0_i32_1 = arith.constant 0 : i32
    return %c0_i32, %c0_i32_0 : i32, i32
  }
  func.func @transform_3(%arg0: i32) -> (i32, i32) {
    %c0_i32 = arith.constant 0 : i32
    %c0_i32_0 = arith.constant 0 : i32
    %c0_i32_1 = arith.constant 0 : i32
    return %c0_i32, %c0_i32_0 : i32, i32
  }
  func.func @transform_4(%arg0: i32) -> (i32, i32) {
    %c0_i32 = arith.constant 0 : i32
    %c0_i32_0 = arith.constant 0 : i32
    %c0_i32_1 = arith.constant 0 : i32
    return %c0_i32, %c0_i32_0 : i32, i32
  }
  func.func @transform_5(%arg0: i32) -> (i32, i32) {
    %c0_i32 = arith.constant 0 : i32
    %c0_i32_0 = arith.constant 0 : i32
    %c0_i32_1 = arith.constant 0 : i32
    return %c0_i32, %c0_i32_0 : i32, i32
  }
  func.func @transform_6(%arg0: i32) -> (i32, i32) {
    %c0_i32 = arith.constant 0 : i32
    %c0_i32_0 = arith.constant 0 : i32
    %c0_i32_1 = arith.constant 0 : i32
    return %c0_i32, %c0_i32_0 : i32, i32
  }
  func.func @transform_7(%arg0: i32) -> (i32, i32) {
    %c0_i32 = arith.constant 0 : i32
    %c0_i32_0 = arith.constant 0 : i32
    %c0_i32_1 = arith.constant 0 : i32
    return %c0_i32, %c0_i32_0 : i32, i32
  }
  func.func @transform_8(%arg0: i32) -> (i32, i32) {
    %c0_i32 = arith.constant 0 : i32
    %c0_i32_0 = arith.constant 0 : i32
    %c0_i32_1 = arith.constant 0 : i32
    return %c0_i32, %c0_i32_0 : i32, i32
  }
  func.func @transform_9(%arg0: i32) -> (i32, i32) {
    %c0_i32 = arith.constant 0 : i32
    %c0_i32_0 = arith.constant 0 : i32
    %c0_i32_1 = arith.constant 0 : i32
    return %c0_i32, %c0_i32_0 : i32, i32
  }
  func.func @transform_10(%arg0: i32) -> (i32, i32) {
    %c0_i32 = arith.constant 0 : i32
    %c0_i32_0 = arith.constant 0 : i32
    return %arg0, %c0_i32 : i32, i32
  }
}

</mosaic_0001>

<bundles_post_ra>
// kernel: tpu_custom_call.1
= control target key start
LH: loop header
LB: loop body
LE: loop exit
PB: predicated region body
PF: predicated region fallthrough
CT: control target
= control target key end

     0   :  { %15 = vsyncpa [#allocation3], 0  ;;  %s1296_s0 = inlined_call_operand.hbm [shape: f32[2,8,32], index: 0, kind: input, shape index: {}]   ;;  %s1297_s1 = inlined_call_operand.hbm [shape: f32[128,128], index: 1, kind: input, shape index: {}]   ;;  %s1298_s2 = inlined_call_operand.vmem [shape: f32[1,128], index: 2, kind: input, shape index: {}]   ;;  %s1299_s3 = inlined_call_operand.vmem [shape: f32[8,128], index: 3, kind: input, shape index: {}]   ;;  %s1300_s4 = inlined_call_operand.hbm [shape: f32[128,128], index: 4, kind: input, shape index: {}]   ;;  %s1301_s5 = inlined_call_operand.vmem [shape: f32[1,128], index: 5, kind: input, shape index: {}]   ;;  %s1302_s6 = inlined_call_operand.hbm [shape: f32[128,128], index: 6, kind: input, shape index: {}]   ;;  %s1303_s7 = inlined_call_operand.vmem [shape: f32[1,128], index: 7, kind: input, shape index: {}]   ;;  %s1304_s8 = inlined_call_operand.hbm [shape: f32[128,128], index: 8, kind: input, shape index: {}]   ;;  %s1305_s9 = inlined_call_operand.vmem [shape: f32[1,128], index: 9, kind: input, shape index: {}]   ;;  %s1306_s10 = inlined_call_operand.hbm [shape: f32[2,128], index: 10, kind: output, shape index: {}]  }
   0x1   :  { %16 = vsyncpa [#allocation6], 0 }
   0x2   :  { %17 = vsyncpa [#allocation9], 0 }
   0x3   :  { %18 = vsyncpa [#allocation4], 0  ;;  %s1060_s13 = smov [#allocation5]   ;;  %s1061_s15 = smov [#allocation8]  }
   0x4   :  { %s36_s14 = sshll.u32 %s1060_s13, 4  ;;  %s66_s16 = sshll.u32 %s1061_s15, 4  ;;  %s37_s14 = int_to_ptr.vmem [resolvable:$true] %s36_s14  ;;  %s1129_s16 = int_to_ptr.vmem [resolvable:$true] %s66_s16 }
   0x5   :  { %s920_s19 = scalar_lea.hbm %s1297_s1, 2048 }
   0x6   :  { %p921_p0 = scmp.ne.s32.totalorder %s1297_s1, %s920_s19  ;;  %p924_p1 = scmp.lt.u32.totalorder %s920_s19, %s1297_s1 }
   0x8   :  { %p926_p2 = pnand %p924_p1, %p921_p0 }
   0xa   :  { %929 = shalt.err (!%p926_p2)
}
   0xb   :  { %s930_s24 = scalar_lea.vmem %s37_s14, 2048  ;;  %p935_p4 = scmp.lt.s32.totalorder %s37_s14, %s37_s14 }
   0xc   :  { %p931_p3 = scmp.ne.s32.totalorder %s37_s14, %s930_s24  ;;  %p936_p5 = scmp.lt.s32.totalorder %s930_s24, %s930_s24 }
   0xe   :  { %p937_p6 = por %p936_p5, %p935_p4 }
  0x10   :  { %p938_p7 = pnand %p937_p6, %p931_p3 }
  0x12   :  { %941 = shalt.err (!%p938_p7)
}
  0x13   :  { %s1062_s25 = smov 128   ;;  %s1063_s26 = smov 8  }
  0x14   :  { %42 = dma.hbm_to_vmem [thread:$0]  %s1297_s1, 2048, %s37_s14, [#allocation6], %s1062_s25, %s1062_s25, %s1063_s26  }
  0x15   :  { %s942_s11 = scalar_lea.hbm %s1302_s6, 2048 }
  0x16   :  { %p943_p8 = scmp.ne.s32.totalorder %s1302_s6, %s942_s11  ;;  %p946_p9 = scmp.lt.u32.totalorder %s942_s11, %s1302_s6 }
  0x18   :  { %p948_p10 = pnand %p946_p9, %p943_p8 }
  0x1a   :  { %951 = shalt.err (!%p948_p10)
}
  0x1b   :  { %s952_s18 = scalar_lea.vmem %s1129_s16, 2048  ;;  %p957_p12 = scmp.lt.s32.totalorder %s1129_s16, %s1129_s16 }
  0x1c   :  { %p953_p11 = scmp.ne.s32.totalorder %s1129_s16, %s952_s18  ;;  %p958_p13 = scmp.lt.s32.totalorder %s952_s18, %s952_s18 }
  0x1e   :  { %p959_p0 = por %p958_p13, %p957_p12 }
  0x20   :  { %p960_p1 = pnand %p959_p0, %p953_p11 }
  0x22   :  { %963 = shalt.err (!%p960_p1)
}
  0x23   :  { %72 = dma.hbm_to_vmem [thread:$0]  %s1302_s6, 2048, %s1129_s16, [#allocation9], %s1062_s25, %s1062_s25, %s1063_s26  }
  0x24   :  { %s1064_s19 = smov [#allocation2]   ;;  %s1065_s21 = smov [#allocation7]  }
  0x25   :  { %s24_s20 = sshll.u32 %s1064_s19, 4  ;;  %s52_s22 = sshll.u32 %s1065_s21, 4  ;;  %s25_s20 = int_to_ptr.vmem [resolvable:$true] %s24_s20  ;;  %s1166_s22 = int_to_ptr.vmem [resolvable:$true] %s52_s22 }
  0x26   :  { %s964_s27 = scalar_lea.hbm %s1296_s0, 256 }
  0x27   :  { %p965_p2 = scmp.ne.s32.totalorder %s1296_s0, %s964_s27  ;;  %p968_p3 = scmp.lt.u32.totalorder %s964_s27, %s1296_s0 }
  0x29   :  { %p970_p4 = pnand %p968_p3, %p965_p2 }
  0x2b   :  { %973 = shalt.err (!%p970_p4)
}
  0x2c   :  { %s974_s6 = scalar_lea.vmem %s25_s20, 256  ;;  %p979_p6 = scmp.lt.s32.totalorder %s25_s20, %s25_s20 }
  0x2d   :  { %p975_p5 = scmp.ne.s32.totalorder %s25_s20, %s974_s6  ;;  %p980_p7 = scmp.lt.s32.totalorder %s974_s6, %s974_s6 }
  0x2f   :  { %p981_p8 = por %p980_p7, %p979_p6 }
  0x31   :  { %p982_p9 = pnand %p981_p8, %p975_p5 }
  0x33   :  { %985 = shalt.err (!%p982_p9)
}
  0x34   :  { %30 = dma.hbm_to_vmem [thread:$0]  %s1296_s0, 256, %s25_s20, [#allocation3], %s1062_s25, %s1062_s25, %s1063_s26  }
  0x35   :  { %s986_s17 = scalar_lea.hbm %s1300_s4, 2048 }
  0x36   :  { %p987_p10 = scmp.ne.s32.totalorder %s1300_s4, %s986_s17  ;;  %p990_p11 = scmp.lt.u32.totalorder %s986_s17, %s1300_s4 }
  0x38   :  { %p992_p12 = pnand %p990_p11, %p987_p10 }
  0x3a   :  { %995 = shalt.err (!%p992_p12)
}
  0x3b   :  { %s996_s21 = scalar_lea.vmem %s1166_s22, 2048  ;;  %p1001_p0 = scmp.lt.s32.totalorder %s1166_s22, %s1166_s22 }
  0x3c   :  { %p997_p13 = scmp.ne.s32.totalorder %s1166_s22, %s996_s21  ;;  %p1002_p1 = scmp.lt.s32.totalorder %s996_s21, %s996_s21 }
  0x3e   :  { %p1003_p2 = por %p1002_p1, %p1001_p0 }
  0x40   :  { %p1004_p3 = pnand %p1003_p2, %p997_p13 }
  0x42   :  { %1007 = shalt.err (!%p1004_p3)
}
  0x43   :  { %58 = dma.hbm_to_vmem [thread:$0]  %s1300_s4, 2048, %s1166_s22, [#allocation6], %s1062_s25, %s1062_s25, %s1063_s26  }
  0x44   :  { %s1066_s23 = smov [#allocation10]   ;;  %s1008_s29 = scalar_lea.hbm %s1304_s8, 2048 }
  0x45   :  { %s80_s24 = sshll.u32 %s1066_s23, 4  ;;  %p1009_p4 = scmp.ne.s32.totalorder %s1304_s8, %s1008_s29  ;;  %s81_s24 = int_to_ptr.vmem [resolvable:$true] %s80_s24 }
  0x46   :  { %p1012_p5 = scmp.lt.u32.totalorder %s1008_s29, %s1304_s8 }
  0x48   :  { %p1014_p6 = pnand %p1012_p5, %p1009_p4 }
  0x4a   :  { %1017 = shalt.err (!%p1014_p6)
}
  0x4b   :  { %s1018_s12 = scalar_lea.vmem %s81_s24, 2048  ;;  %p1023_p8 = scmp.lt.s32.totalorder %s81_s24, %s81_s24 }
  0x4c   :  { %p1019_p7 = scmp.ne.s32.totalorder %s81_s24, %s1018_s12  ;;  %p1024_p9 = scmp.lt.s32.totalorder %s1018_s12, %s1018_s12 }
  0x4e   :  { %p1025_p10 = por %p1024_p9, %p1023_p8 }
  0x50   :  { %p1026_p11 = pnand %p1025_p10, %p1019_p7 }
  0x52   :  { %1029 = shalt.err (!%p1026_p11)
}
  0x53   :  { %86 = dma.hbm_to_vmem [thread:$0]  %s1304_s8, 2048, %s81_s24, [#allocation9], %s1062_s25, %s1062_s25, %s1063_s26  }
  0x54   :  { %1052 = dma.done.wait [#allocation3], 256  }
  0x55   :  { %1053 = vsyncadd [#allocation3], 4294967040 }
  0x56   :  { %1054 = dma.done.wait [#allocation6], 4096  }
  0x57   :  { %1055 = vsyncadd [#allocation6], 4294963200 }
  0x58   :  { %1056 = dma.done.wait [#allocation9], 4096  }
  0x59   :  { %1057 = vsyncadd [#allocation9], 4294963200  ;;  %vm109_vm0 = vcmask 1046528   ;;  %v1067_v0 = vmov 0.0   ;;  %v1220_v3 = vld [vmem:[#allocation2] sm:$0xff]  ;;  %v1222_v4 = vld [vmem:[#allocation2 + $0x8] sm:$0xff] }
  0x5a   :  { %v111_v1 = vrot.slane %v1067_v0, 1  ;;  %v123_v2 = vrot.slane %v1067_v0, 2  ;;  %vm121_vm1 = vcmask 1045504   ;;  %vm133_vm2 = vcmask 1044480   ;;  %v154_v6 = vld [vmem:[#allocation5] sm:$0xff]  ;;  %v155_v11 = vld [vmem:[#allocation5 + $0x8] sm:$0xff] }
  0x5b   :  { %v135_v5 = vrot.slane %v1067_v0, 3  ;;  %v110_v7 = vrot.slane %v1220_v3, 1  ;;  %v113_v8 = vrot.slane %v1222_v4, 1  ;;  %v122_v9 = vrot.slane %v1220_v3, 2  ;;  %v156_v15 = vld [vmem:[#allocation5 + $0x10] sm:$0xff]  ;;  %v157_v16 = vld [vmem:[#allocation5 + $0x18] sm:$0xff] }
  0x5c   :  { %v125_v10 = vrot.slane %v1222_v4, 2  ;;  %v134_v12 = vrot.slane %v1220_v3, 3  ;;  %v137_v13 = vrot.slane %v1222_v4, 3  ;;  %v787_v14 = vpack.c.bf16 %v155_v11, %v154_v6  ;;  %v158_v21 = vld [vmem:[#allocation5 + $0x20] sm:$0xff]  ;;  %v159_v22 = vld [vmem:[#allocation5 + $0x28] sm:$0xff]  ;;  %s1069_s8 = smov 32  }
  0x5d   :  { %v112_v17 = vsel %vm109_vm0, %v110_v7, %v111_v1  ;;  %v114_v18 = vsel %vm109_vm0, %v113_v8, %v111_v1  ;;  %v124_v19 = vsel %vm121_vm1, %v122_v9, %v123_v2  ;;  %v1068_v23 = vmov 0.0|0.0   ;;  %v160_v31 = vld [vmem:[#allocation5 + $0x30] sm:$0xff]  ;;  %v269_v32 = vld [vmem:[#allocation7] sm:$0xff]  ;;  %v270_v33 = vld [vmem:[#allocation7 + $0x8] sm:$0xff]  ;;  %s1070_s25 = smov 96   ;;  %s1071_s26 = smov 64  }
  0x5e   :  { %v126_v20 = vsel %vm121_vm1, %v125_v10, %v123_v2  ;;  %819 = vmatprep.subr.bf16.mxu1 %v1068_v23  ;;  %v905_v24 = vpack.i.bf16 %v114_v18, %v112_v17  ;;  %v136_v25 = vsel %vm133_vm2, %v134_v12, %v135_v5  ;;  %v138_v26 = vsel %vm133_vm2, %v137_v13, %v135_v5  ;;  %v161_v34 = vld [vmem:[#allocation5 + $0x38] sm:$0xff]  ;;  %v271_v36 = vld [vmem:[#allocation7 + $0x10] sm:$0xff]  ;;  %v273_v40 = vld [vmem:[#allocation7 + $0x20] sm:$0xff]  ;;  %s1073_s21 = smov [#allocation11]  }
  0x5f   :  { %788 = vmatprep.subr.bf16.mxu0 %v787_v14  ;;  %v915_v27 = vpack.i.bf16 %v138_v26, %v136_v25  ;;  %v791_v28 = vpack.c.bf16 %v157_v16, %v156_v15  ;;  %v910_v29 = vpack.i.bf16 %v126_v20, %v124_v19  ;;  %v795_v30 = vpack.c.bf16 %v159_v22, %v158_v21  ;;  %v272_v37 = vld [vmem:[#allocation7 + $0x18] sm:$0xff]  ;;  %v274_v41 = vld [vmem:[#allocation7 + $0x28] sm:$0xff]  ;;  %v162_v42 = vld [vmem:[#allocation5 + $0x40] sm:$0xff]  ;;  %s563_s0 = sshll.u32 %s1073_s21, 4  ;;  %s564_s0 = int_to_ptr.vmem [resolvable:$true] %s563_s0 }
  0x60   :  { %790 = vmatpush3.bf16.msra.mxu0 %v787_v14  ;;  %906 = vrot.lane.b32.xlu0 %v905_v24, %s1069_s8  ;;  %v820_v35 = vpack.c.bf16 %v270_v33, %v269_v32  ;;  %v823_v38 = vpack.c.bf16 %v272_v37, %v271_v36  ;;  %v799_v39 = vpack.c.bf16 %v161_v34, %v160_v31  ;;  %v163_v43 = vld [vmem:[#allocation5 + $0x48] sm:$0xff]  ;;  %v164_v46 = vld [vmem:[#allocation5 + $0x50] sm:$0xff]  ;;  %v165_v47 = vld [vmem:[#allocation5 + $0x58] sm:$0xff]  ;;  %vm145_vm3 = vcmask 261120   ;;  %s1030_s20 = scalar_lea.vmem %s564_s0, 32  ;;  %p1035_p13 = scmp.lt.s32.totalorder %s564_s0, %s564_s0 }
  0x61   :  { %916 = vrot.lane.b32.xlu1 %v915_v27, %s1070_s25  ;;  %792 = vmatprep.subr.bf16.mxu0 %v791_v28  ;;  %v826_v44 = vpack.c.bf16 %v274_v41, %v273_v40  ;;  %v803_v45 = vpack.c.bf16 %v163_v43, %v162_v42  ;;  %v807_v48 = vpack.c.bf16 %v165_v47, %v164_v46  ;;  %v166_v49 = vld [vmem:[#allocation5 + $0x60] sm:$0xff]  ;;  %v167_v50 = vld [vmem:[#allocation5 + $0x68] sm:$0xff]  ;;  %v168_v52 = vld [vmem:[#allocation5 + $0x70] sm:$0xff]  ;;  %vm148_vm4 = vcmask 523264   ;;  %p1031_p12 = scmp.ne.s32.totalorder %s564_s0, %s1030_s20  ;;  %p1036_p0 = scmp.lt.s32.totalorder %s1030_s20, %s1030_s20 }
  0x62   :  { %821 = vmatpush3.bf16.msra.mxu1 %v820_v35  ;;  %v811_v51 = vpack.c.bf16 %v167_v50, %v166_v49  ;;  %v169_v53 = vld [vmem:[#allocation5 + $0x78] sm:$0xff]  ;;  %vm151_vm5 = vcmask 785408   ;;  %v275_v9 = vld [vmem:[#allocation7 + $0x30] sm:$0xff]  ;;  %v277_v12 = vld [vmem:[#allocation7 + $0x40] sm:$0xff]  ;;  %vm1072_vm6 = vmmov 0   ;;  %vm295_vm7 = vcmask 1041409  }
  0x63   :  { %822 = vmatprep.subr.bf16.mxu1 %v1068_v23  ;;  %v815_v54 = vpack.c.bf16 %v169_v53, %v168_v52  ;;  %v276_v10 = vld [vmem:[#allocation7 + $0x38] sm:$0xff]  ;;  %v278_v13 = vld [vmem:[#allocation7 + $0x48] sm:$0xff]  ;;  %v281_v16 = vld [vmem:[#allocation7 + $0x60] sm:$0xff]  ;;  %714 = vmatprep.mubr.msk.f32.mxu1 %vm1072_vm6, %v1067_v0  ;;  %p1037_p1 = por %p1036_p0, %p1035_p13 }
  0x64   :  { %794 = vmatpush3.bf16.msra.mxu0 %v791_v28  ;;  %911 = vrot.lane.b32.xlu0 %v910_v29, %s1071_s26  ;;  %v829_v11 = vpack.c.bf16 %v276_v10, %v275_v9  ;;  %v832_v14 = vpack.c.bf16 %v278_v13, %v277_v12  ;;  %v282_v17 = vld [vmem:[#allocation7 + $0x68] sm:$0xff]  ;;  %v283_v19 = vld [vmem:[#allocation7 + $0x70] sm:$0xff]  ;;  %v284_v20 = vld [vmem:[#allocation7 + $0x78] sm:$0xff] }
  0x65   :  { %796 = vmatprep.subr.bf16.mxu0 %v795_v30  ;;  %v838_v18 = vpack.c.bf16 %v282_v17, %v281_v16  ;;  %v841_v21 = vpack.c.bf16 %v284_v20, %v283_v19  ;;  %v369_v22 = vld [vmem:[#allocation8] sm:$0xff]  ;;  %v370_v24 = vld [vmem:[#allocation8 + $0x8] sm:$0xff]  ;;  %v371_v25 = vld [vmem:[#allocation8 + $0x10] sm:$0xff]  ;;  %p1038_p2 = pnand %p1037_p1, %p1031_p12 }
  0x66   :  { %824 = vmatpush3.bf16.msra.mxu1 %v823_v38  ;;  %v844_v26 = vpack.c.bf16 %v370_v24, %v369_v22  ;;  %v372_v27 = vld [vmem:[#allocation8 + $0x18] sm:$0xff]  ;;  %v373_v29 = vld [vmem:[#allocation8 + $0x20] sm:$0xff]  ;;  %v375_v32 = vld [vmem:[#allocation8 + $0x30] sm:$0xff] }
  0x67   :  { %825 = vmatprep.subr.bf16.mxu1 %v1068_v23  ;;  %v847_v28 = vpack.c.bf16 %v372_v27, %v371_v25  ;;  %v376_v33 = vld [vmem:[#allocation8 + $0x38] sm:$0xff]  ;;  %v377_v35 = vld [vmem:[#allocation8 + $0x40] sm:$0xff]  ;;  %v378_v36 = vld [vmem:[#allocation8 + $0x48] sm:$0xff] }
  0x68   :  { %798 = vmatpush3.bf16.msra.mxu0 %v795_v30  ;;  %v374_v30 = vld [vmem:[#allocation8 + $0x28] sm:$0xff]  ;;  %v853_v34 = vpack.c.bf16 %v376_v33, %v375_v32  ;;  %v856_v37 = vpack.c.bf16 %v378_v36, %v377_v35  ;;  %v379_v38 = vld [vmem:[#allocation8 + $0x50] sm:$0xff]  ;;  %v381_v41 = vld [vmem:[#allocation8 + $0x60] sm:$0xff] }
  0x69   :  { %800 = vmatprep.subr.bf16.mxu0 %v799_v39  ;;  %v850_v31 = vpack.c.bf16 %v374_v30, %v373_v29  ;;  %v382_v42 = vld [vmem:[#allocation8 + $0x68] sm:$0xff]  ;;  %v463_v10 = vld [vmem:[#allocation10] sm:$0xff]  ;;  %v465_v12 = vld [vmem:[#allocation10 + $0x10] sm:$0xff] }
  0x6a   :  { %827 = vmatpush3.bf16.msra.mxu1 %v826_v44  ;;  %v862_v43 = vpack.c.bf16 %v382_v42, %v381_v41  ;;  %v170_v44 = vld [vmem:[%s1299_s3] sm:$0xff]  ;;  %v470_v17 = vld [vmem:[#allocation10 + $0x38] sm:$0xff]  ;;  %v471_v19 = vld [vmem:[#allocation10 + $0x40] sm:$0xff] }
  0x6b   :  { %828 = vmatprep.subr.bf16.mxu1 %v1068_v23  ;;  %v472_v20 = vld [vmem:[#allocation10 + $0x48] sm:$0xff]  ;;  %v473_v22 = vld [vmem:[#allocation10 + $0x50] sm:$0xff]  ;;  %v474_v24 = vld [vmem:[#allocation10 + $0x58] sm:$0xff] }
  0x6c   :  { %802 = vmatpush3.bf16.msra.mxu0 %v799_v39  ;;  %v380_v39 = vld [vmem:[#allocation8 + $0x58] sm:$0xff]  ;;  %v883_v25 = vpack.c.bf16 %v474_v24, %v473_v22  ;;  %v476_v27 = vld [vmem:[#allocation10 + $0x68] sm:$0xff]  ;;  %v575_v29 = vld [vmem:[%s1301_s5] ss:$0 sm:$0xff] }
  0x6d   :  { %804 = vmatprep.subr.bf16.mxu0 %v803_v45  ;;  %v859_v40 = vpack.c.bf16 %v380_v39, %v379_v38  ;;  %v478_v35 = vld [vmem:[#allocation10 + $0x78] sm:$0xff]  ;;  %v577_v41 = vld [vmem:[%s1305_s9] ss:$0 sm:$0xff] }
  0x6e   :  { %830 = vmatpush3.bf16.msra.mxu1 %v829_v11  ;;  %v464_v11 = vld [vmem:[#allocation10 + $0x8] sm:$0xff] }
  0x6f   :  { %831 = vmatprep.subr.bf16.mxu1 %v1068_v23  ;;  %v868_v13 = vpack.c.bf16 %v464_v11, %v463_v10 }
  0x70   :  { %806 = vmatpush3.bf16.msra.mxu0 %v803_v45 }
  0x71   :  { %808 = vmatprep.subr.bf16.mxu0 %v807_v48 }
  0x72   :  { %833 = vmatpush3.bf16.msra.mxu1 %v832_v14  ;;  %v466_v14 = vld [vmem:[#allocation10 + $0x18] sm:$0xff] }
  0x73   :  { %834 = vmatprep.subr.bf16.mxu1 %v1068_v23 }
  0x74   :  { %810 = vmatpush3.bf16.msra.mxu0 %v807_v48 }
  0x75   :  { %812 = vmatprep.subr.bf16.mxu0 %v811_v51 }
  0x78   :  { %814 = vmatpush3.bf16.msra.mxu0 %v811_v51 }
  0x79   :  { %816 = vmatprep.subr.bf16.mxu0 %v815_v54 }
  0x7c   :  { %818 = vmatpush3.bf16.msra.mxu0 %v815_v54 }
  0x7d   :  { %843 = vmatprep.subr.bf16.mxu0 %v1068_v23 }
  0xd2   :  { %v907_v55 = vpop.permute.xlu0 %906 }
  0xd3   :  { %v917_v56 = vpop.permute.xlu1 %916  ;;  %v909_v57 = vunpack.i.h.bf16 %v907_v55  ;;  %v908_v58 = vunpack.i.l.bf16 %v907_v55 }
  0xd4   :  { %v919_v60 = vunpack.i.h.bf16 %v917_v56  ;;  %v918_v61 = vunpack.i.l.bf16 %v917_v56 }
  0xd5   :  { %v146_v1 = vsel %vm145_vm3, %v1220_v3, %v908_v58  ;;  %v147_v2 = vsel %vm145_vm3, %v1222_v4, %v909_v57  ;;  %v279_v3 = vld [vmem:[#allocation7 + $0x50] sm:$0xff]  ;;  %v280_v4 = vld [vmem:[#allocation7 + $0x58] sm:$0xff] }
  0xd6   :  { %v912_v59 = vpop.permute.xlu0 %911  ;;  %v835_v15 = vpack.c.bf16 %v280_v4, %v279_v3  ;;  %v871_v3 = vpack.c.bf16 %v466_v14, %v465_v12  ;;  %v467_v4 = vld [vmem:[#allocation10 + $0x20] sm:$0xff] }
  0xd7   :  { %v914_v62 = vunpack.i.h.bf16 %v912_v59  ;;  %v913_v63 = vunpack.i.l.bf16 %v912_v59  ;;  %v574_v59 = vld [vmem:[%s1298_s2] ss:$0 sm:$0xff] }
  0xd8   :  { %836 = vmatpush3.bf16.msra.mxu1 %v835_v15  ;;  %v468_v15 = vld [vmem:[#allocation10 + $0x28] sm:$0xff] }
  0xd9   :  { %v149_v5 = vsel %vm148_vm4, %v146_v1, %v913_v63  ;;  %v150_v6 = vsel %vm148_vm4, %v147_v2, %v914_v62  ;;  %837 = vmatprep.subr.bf16.mxu1 %v1068_v23  ;;  %v874_v16 = vpack.c.bf16 %v468_v15, %v467_v4 }
  0xda   :  { %v152_v7 = vsel %vm151_vm5, %v149_v5, %v918_v61  ;;  %v153_v8 = vsel %vm151_vm5, %v150_v6, %v919_v60 }
  0xdb   :  { %679 = vmatprep.mubr.f32.mxu0 %v152_v7  ;;  %v383_v7 = vld [vmem:[#allocation8 + $0x70] sm:$0xff] }
  0xdc   :  { %680 = vmatmul.mubr.f32.vlgmr.msra.gmra.mrb[0].mxu0 %v153_v8  ;;  %839 = vmatpush3.bf16.msra.mxu1 %v838_v18  ;;  %v384_v8 = vld [vmem:[#allocation8 + $0x78] sm:$0xff] }
  0xdd   :  { %840 = vmatprep.subr.bf16.mxu1 %v1068_v23  ;;  %749 = vmatprep.mubr.msk.f32.mxu0 %vm1072_vm6, %v1067_v0  ;;  %v865_v9 = vpack.c.bf16 %v384_v8, %v383_v7 }
  0xde   :  { %845 = vmatpush3.bf16.msra.mxu0 %v844_v26  ;;  %v475_v26 = vld [vmem:[#allocation10 + $0x60] sm:$0xff] }
  0xdf   :  { %846 = vmatprep.subr.bf16.mxu0 %v1068_v23 }
  0xe0   :  { %842 = vmatpush3.bf16.msra.mxu1 %v841_v21  ;;  %v880_v21 = vpack.c.bf16 %v472_v20, %v471_v19 }
  0xe1   :  { %867 = vmatprep.subr.bf16.mxu1 %v1068_v23 }
  0xe2   :  { %848 = vmatpush3.bf16.msra.mxu0 %v847_v28  ;;  %v886_v28 = vpack.c.bf16 %v476_v27, %v475_v26 }
  0xe3   :  { %849 = vmatprep.subr.bf16.mxu0 %v1068_v23 }
  0xe6   :  { %851 = vmatpush3.bf16.msra.mxu0 %v850_v31 }
  0xe7   :  { %852 = vmatprep.subr.bf16.mxu0 %v1068_v23 }
  0xea   :  { %854 = vmatpush3.bf16.msra.mxu0 %v853_v34  ;;  %v477_v34 = vld [vmem:[#allocation10 + $0x70] sm:$0xff] }
  0xeb   :  { %855 = vmatprep.subr.bf16.mxu0 %v1068_v23  ;;  %v889_v36 = vpack.c.bf16 %v478_v35, %v477_v34 }
  0xee   :  { %857 = vmatpush3.bf16.msra.mxu0 %v856_v37  ;;  %v576_v37 = vld [vmem:[%s1303_s7] ss:$0 sm:$0xff] }
  0xef   :  { %858 = vmatprep.subr.bf16.mxu0 %v1068_v23 }
  0xf2   :  { %860 = vmatpush3.bf16.msra.mxu0 %v859_v40 }
  0xf3   :  { %861 = vmatprep.subr.bf16.mxu0 %v1068_v23 }
  0xf6   :  { %863 = vmatpush3.bf16.msra.mxu0 %v862_v43 }
  0xf7   :  { %864 = vmatprep.subr.bf16.mxu0 %v1068_v23 }
  0xfa   :  { %866 = vmatpush3.bf16.msra.mxu0 %v865_v9 }
 0x1af   :  { %v681_v45 = vpop.f32.mrb[0].mxu0 }
 0x1b0   :  { %v243_v46 = vadd.f32 %v681_v45, %v170_v44  ;;  %v237_v47 = vpop.f32.mrb[1].mxu0 }
 0x1b1   :  { %v238_v48 = vadd.f32 %v237_v47, %v170_v44 }
 0x1b2   :  { %v252_v49 = vrot.slane %v243_v46, 4 }
 0x1b3   :  { %v246_v50 = vrot.slane %v238_v48, 4 }
 0x1b4   :  { %v253_v51 = vmax.f32 %v243_v46, %v252_v49 }
 0x1b5   :  { %v247_v52 = vmax.f32 %v238_v48, %v246_v50 }
 0x1b6   :  { %v254_v53 = vrot.slane %v253_v51, 2 }
 0x1b7   :  { %v248_v54 = vrot.slane %v247_v52, 2 }
 0x1b8   :  { %v255_v55 = vmax.f32 %v253_v51, %v254_v53 }
 0x1b9   :  { %v249_v56 = vmax.f32 %v247_v52, %v248_v54 }
 0x1ba   :  { %v256_v57 = vrot.slane %v255_v55, 1 }
 0x1bb   :  { %v250_v58 = vrot.slane %v249_v56, 1 }
 0x1bc   :  { %v257_v60 = vmax.f32 %v255_v55, %v256_v57 }
 0x1bd   :  { %v251_v61 = vmax.f32 %v249_v56, %v250_v58 }
 0x1be   :  { %v266_v62 = vadd.f32 %v574_v59, %v257_v60 }
 0x1bf   :  { %v265_v63 = vadd.f32 %v574_v59, %v251_v61 }
 0x1c0   :  { %v268_v1 = vmax.f32 %v266_v62, 0.0 }
 0x1c1   :  { %v267_v2 = vmax.f32 %v265_v63, 0.0 }
 0x1c2   :  { %v294_v5 = vrot.slane %v268_v1, 7 }
 0x1c4   :  { %v296_v6 = vsel %vm295_vm7, %v294_v5, %v267_v2 }
 0x1c5   :  { %715 = vmatmul.mubr.f32.vlgmr.msra.gmra.mrb[0].mxu1 %v296_v6 }
 0x1c6   :  { %784 = vmatprep.mubr.msk.f32.mxu1 %vm1072_vm6, %v1067_v0  ;;  %869 = vmatpush3.bf16.msra.mxu1 %v868_v13  ;;  %v469_v0 = vld [vmem:[#allocation10 + $0x30] sm:$0xff] }
 0x1c7   :  { %870 = vmatprep.subr.bf16.mxu1 %v1068_v23  ;;  %v877_v18 = vpack.c.bf16 %v470_v17, %v469_v0 }
 0x1ca   :  { %872 = vmatpush3.bf16.msra.mxu1 %v871_v3 }
 0x1cb   :  { %873 = vmatprep.subr.bf16.mxu1 %v1068_v23 }
 0x1ce   :  { %875 = vmatpush3.bf16.msra.mxu1 %v874_v16 }
 0x1cf   :  { %876 = vmatprep.subr.bf16.mxu1 %v1068_v23 }
 0x1d2   :  { %878 = vmatpush3.bf16.msra.mxu1 %v877_v18 }
 0x1d3   :  { %879 = vmatprep.subr.bf16.mxu1 %v1068_v23 }
 0x1d6   :  { %881 = vmatpush3.bf16.msra.mxu1 %v880_v21 }
 0x1d7   :  { %882 = vmatprep.subr.bf16.mxu1 %v1068_v23 }
 0x1da   :  { %884 = vmatpush3.bf16.msra.mxu1 %v883_v25 }
 0x1db   :  { %885 = vmatprep.subr.bf16.mxu1 %v1068_v23 }
 0x1de   :  { %887 = vmatpush3.bf16.msra.mxu1 %v886_v28 }
 0x1df   :  { %888 = vmatprep.subr.bf16.mxu1 %v1068_v23 }
 0x1e2   :  { %890 = vmatpush3.bf16.msra.mxu1 %v889_v36 }
 0x298   :  { %v364_v30 = vpop.f32.mrb[0].mxu1 }
 0x299   :  { %v365_v31 = vadd.f32 %v575_v29, %v364_v30  ;;  %v716_v32 = vpop.f32.mrb[1].mxu1 }
 0x29b   :  { %v368_v33 = vmax.f32 %v365_v31, 0.0 }
 0x29d   :  { %750 = vmatmul.mubr.f32.vlgmr.msra.gmra.mrb[2].mxu0 %v368_v33 }
 0x370   :  { %v458_v38 = vpop.f32.mrb[2].mxu0 }
 0x371   :  { %v459_v39 = vadd.f32 %v576_v37, %v458_v38  ;;  %v751_v23 = vpop.f32.mrb[3].mxu0 }
 0x373   :  { %v462_v40 = vmax.f32 %v459_v39, 0.0 }
 0x375   :  { %785 = vmatmul.mubr.f32.vlgmr.msra.gmra.mrb[2].mxu1 %v462_v40 }
 0x448   :  { %v552_v42 = vpop.f32.mrb[2].mxu1 }
 0x449   :  { %v553_v43 = vadd.f32 %v577_v41, %v552_v42  ;;  %v786_v44 = vpop.f32.mrb[3].mxu1 }
 0x44b   :  { %556 = vst [vmem:[#allocation11] sm:$0x3] %v553_v43 }
 0x44c   :  { %1041 = shalt.err (!%p1038_p2)
}
 0x44d   :  { %s1042_s24 = scalar_lea.hbm %s1306_s10, 32 }
 0x44e   :  { %p1043_p3 = scmp.ne.s32.totalorder %s1306_s10, %s1042_s24  ;;  %p1046_p4 = scmp.lt.u32.totalorder %s1042_s24, %s1306_s10 }
 0x450   :  { %p1048_p5 = pnand %p1046_p4, %p1043_p3 }
 0x452   :  { %1051 = shalt.err (!%p1048_p5)
}
 0x453   :  { %566 = dma.vmem_to_hbm [thread:$0]  %s564_s0, 32, %s1306_s10, [#allocation4]  }
 0x454   :  { %1058 = dma.done.wait [#allocation4], 32  }
 0x455   :  { %1059 = vsyncadd [#allocation4], 4294967264 }
 0x456   :  { %570 = vsyncpa [#allocation3], 1 }
 0x457   :  { %571 = vsyncpa [#allocation6], 1 }
 0x458   :  { %572 = vsyncpa [#allocation9], 1 }
 0x459   :  { %573 = vsyncpa [#allocation4], 1 }

</bundles_post_ra>
